<compile_context>
chip_gen: v5e
topology: v5e:2x2
jax: 0.10.0
libtpu: 0.0.40
codegen_flags: <defaults>
</compile_context>

<pallas_src>
import jax
import jax.numpy as jnp
import numpy as np
from jax.experimental import pallas as pl
from jax.experimental.pallas import tpu as pltpu

# Defaults matching raylab.envs.environments.reservoir.DEFAULT_CONFIG.
# TODO(synk): the real module imports DEFAULT_CONFIG from the env file; the
# relevant values are inlined here so the script is self-contained.
DEFAULT_CONFIG = {
    "LOWER_BOUND": (20.0, 20.0, 20.0, 20.0, 20.0, 20.0, 20.0, 20.0),
    "UPPER_BOUND": (80.0, 80.0, 180.0, 280.0, 380.0, 480.0, 780.0, 980.0),
    "LOW_PENALTY": (-5.0,) * 8,
    "HIGH_PENALTY": (-100.0,) * 8,
}

_SUB = 8              # sublane granularity
_LANES = 128          # lane width (dense, unmasked stores)
_MAX_BLOCK_ROWS = 256  # 256 rows x 128 lanes = 32768 batch elems / grid step


def _make_reservoir_kernel(lower, upper, low_pen, high_pen):
    """Build the kernel with per-reservoir constants baked in."""
    n_res = len(lower)
    mid = tuple((lo + hi) * 0.5 for lo, hi in zip(lower, upper))

    def kernel(ns_ref, out_ref):
        # ns_ref : (n_res, R_BLOCK, 128)  reservoir levels, feature-major
        # out_ref: (R_BLOCK, 128)
        acc = jnp.zeros(out_ref.shape, jnp.float32)
        for f in range(n_res):  # unrolled at trace time (n_res == 8)
            r = ns_ref[f]                                      # (R_BLOCK, 128)
            dev = -0.01 * jnp.abs(r - mid[f])
            over = high_pen[f] * jnp.maximum(r - upper[f], 0.0)
            under = low_pen[f] * jnp.maximum(lower[f] - r, 0.0)
            acc = acc + (dev + over + under)
        out_ref[...] = acc

    return kernel


def _choose_tiling(b):
    """Return (total_rows, block_rows): rows*128 >= b, all multiples of 8."""
    rows = max(1, -(-b // _LANES))          # ceil(b / 128)
    rows = -(-rows // _SUB) * _SUB          # round up to multiple of 8
    if rows >= 2 * _SUB:
        # keep grid length >= 2 so v7x's two TensorCores both get work
        half = -(-(rows // 2) // _SUB) * _SUB
        block = min(_MAX_BLOCK_ROWS, half)
    else:
        block = rows
    total = -(-rows // block) * block       # pad rows to multiple of block
    return total, block


def reservoir_reward(state, action, next_state, config=None):
    """Pallas implementation of ReservoirReward.forward.

    state / action are unused (signature parity with the PyTorch module).
    next_state: (..., N_RES + 1) float -> returns (...,) float32
    """
    del state, action  # unused by the Reservoir reward
    cfg = dict(DEFAULT_CONFIG)
    if config:
        cfg.update(config)
    lower = tuple(float(x) for x in cfg["LOWER_BOUND"])
    upper = tuple(float(x) for x in cfg["UPPER_BOUND"])
    low_pen = tuple(float(x) for x in cfg["LOW_PENALTY"])
    high_pen = tuple(float(x) for x in cfg["HIGH_PENALTY"])
    n_res = len(lower)

    next_state = jnp.asarray(next_state, jnp.float32)
    rlevel = next_state[..., :-1]                     # (..., n_res)
    batch_shape = rlevel.shape[:-1]
    b = int(np.prod(batch_shape)) if batch_shape else 1

    total_rows, block_rows = _choose_tiling(b)
    b_pad = total_rows * _LANES

    # Feature-major; flattened batch packed densely onto (sublane, lane).
    flat = rlevel.reshape(b, n_res).T                 # (n_res, b)
    flat = jnp.pad(flat, ((0, 0), (0, b_pad - b)))    # zero pad is safe
    packed = flat.reshape(n_res, total_rows, _LANES)  # (n_res, rows, 128)

    grid = (total_rows // block_rows,)
    out = pl.pallas_call(
        _make_reservoir_kernel(lower, upper, low_pen, high_pen),
        out_shape=jax.ShapeDtypeStruct((total_rows, _LANES), jnp.float32),
        grid_spec=pltpu.PrefetchScalarGridSpec(
            num_scalar_prefetch=0,
            grid=grid,
            in_specs=[
                pl.BlockSpec((n_res, block_rows, _LANES), lambda i: (0, i, 0)),
            ],
            out_specs=pl.BlockSpec((block_rows, _LANES), lambda i: (i, 0)),
        ),
        compiler_params=pltpu.CompilerParams(
            dimension_semantics=("parallel",),
        ),
    )(packed)

    return out.reshape(b_pad)[:b].reshape(batch_shape)


def _reference(next_state, cfg):
    rlevel = next_state[..., :-1]
    lower = np.asarray(cfg["LOWER_BOUND"], np.float32)
    upper = np.asarray(cfg["UPPER_BOUND"], np.float32)
    low_pen = np.asarray(cfg["LOW_PENALTY"], np.float32)
    high_pen = np.asarray(cfg["HIGH_PENALTY"], np.float32)
    dev = -0.01 * np.abs(rlevel - (lower + upper) / 2.0)
    over = high_pen * np.maximum(0.0, rlevel - upper)
    under = low_pen * np.maximum(0.0, lower - rlevel)
    return (dev + over + under).sum(-1)


if __name__ == "__main__":
    key = jax.random.PRNGKey(0)
    k1, k2, k3 = jax.random.split(key, 3)

    batch, n_res = 32, 8
    # next_state = [rlevel_0 .. rlevel_7, time]; level range chosen to exercise
    # the underflow, in-bounds, and overflow branches.
    rlevel = jax.random.uniform(k1, (batch, n_res), minval=-50.0, maxval=1100.0)
    time_feat = jax.random.uniform(k2, (batch, 1), minval=0.0, maxval=40.0)
    next_state = jnp.concatenate([rlevel, time_feat], axis=-1)   # (32, 9)
    state = next_state                                           # unused
    action = jax.random.uniform(k3, (batch, n_res), minval=0.0, maxval=1.0)

    # jit the whole wrapper so the slice/transpose/pad fuse with the kernel.
    reward_fn = jax.jit(reservoir_reward)
    reward = jax.block_until_ready(reward_fn(state, action, next_state))

    ref = _reference(np.asarray(next_state), DEFAULT_CONFIG)
    np.testing.assert_allclose(np.asarray(reward), ref, rtol=1e-5, atol=1e-3)

    print("KERNEL_OK")
</pallas_src>

<mosaic_0001>
module attributes {stable_mosaic.version = 11 : i64} {
  func.func @kernel(%arg0: i32, %arg1: memref<8x8x128xf32, #tpu.memory_space<vmem>>, %arg2: memref<8x128xf32, #tpu.memory_space<vmem>>) attributes {dimension_semantics = [#tpu.dimension_semantics<parallel>], iteration_bounds = array<i64: 1>, scalar_prefetch = 0 : i64, scratch_operands = 0 : i64, tpu.core_type = #tpu.core_type<tc>, window_params = [{transform_indices = @transform_0, window_bounds = array<i64: 8, 8, 128>}, {transform_indices = @transform_1, window_bounds = array<i64: 8, 128>}]} {
    %cst = arith.constant 0.000000e+00 : f32
    %0 = vector.broadcast %cst : f32 to vector<8x128xf32>
    %c0 = arith.constant 0 : index
    %c0_0 = arith.constant 0 : index
    %c0_1 = arith.constant 0 : index
    %1 = vector.load %arg1[%c0, %c0_0, %c0_1] : memref<8x8x128xf32, #tpu.memory_space<vmem>>, vector<1x8x128xf32>
    %2 = vector.shape_cast %1 : vector<1x8x128xf32> to vector<8x128xf32>
    %cst_2 = arith.constant 5.000000e+01 : f32
    %3 = vector.broadcast %cst_2 : f32 to vector<8x128xf32>
    %4 = arith.subf %2, %3 : vector<8x128xf32>
    %5 = math.absf %4 : vector<8x128xf32>
    %cst_3 = arith.constant -0.00999999977 : f32
    %6 = vector.broadcast %cst_3 : f32 to vector<8x128xf32>
    %7 = arith.mulf %6, %5 : vector<8x128xf32>
    %cst_4 = arith.constant 8.000000e+01 : f32
    %8 = vector.broadcast %cst_4 : f32 to vector<8x128xf32>
    %9 = arith.subf %2, %8 : vector<8x128xf32>
    %cst_5 = arith.constant 0.000000e+00 : f32
    %10 = vector.broadcast %cst_5 : f32 to vector<8x128xf32>
    %11 = arith.maximumf %9, %10 : vector<8x128xf32>
    %cst_6 = arith.constant -1.000000e+02 : f32
    %12 = vector.broadcast %cst_6 : f32 to vector<8x128xf32>
    %13 = arith.mulf %12, %11 : vector<8x128xf32>
    %cst_7 = arith.constant 2.000000e+01 : f32
    %14 = vector.broadcast %cst_7 : f32 to vector<8x128xf32>
    %15 = arith.subf %14, %2 : vector<8x128xf32>
    %cst_8 = arith.constant 0.000000e+00 : f32
    %16 = vector.broadcast %cst_8 : f32 to vector<8x128xf32>
    %17 = arith.maximumf %15, %16 : vector<8x128xf32>
    %cst_9 = arith.constant -5.000000e+00 : f32
    %18 = vector.broadcast %cst_9 : f32 to vector<8x128xf32>
    %19 = arith.mulf %18, %17 : vector<8x128xf32>
    %20 = arith.addf %7, %13 : vector<8x128xf32>
    %21 = arith.addf %20, %19 : vector<8x128xf32>
    %22 = arith.addf %0, %21 : vector<8x128xf32>
    %c1 = arith.constant 1 : index
    %c0_10 = arith.constant 0 : index
    %c0_11 = arith.constant 0 : index
    %23 = vector.load %arg1[%c1, %c0_10, %c0_11] : memref<8x8x128xf32, #tpu.memory_space<vmem>>, vector<1x8x128xf32>
    %24 = vector.shape_cast %23 : vector<1x8x128xf32> to vector<8x128xf32>
    %cst_12 = arith.constant 5.000000e+01 : f32
    %25 = vector.broadcast %cst_12 : f32 to vector<8x128xf32>
    %26 = arith.subf %24, %25 : vector<8x128xf32>
    %27 = math.absf %26 : vector<8x128xf32>
    %cst_13 = arith.constant -0.00999999977 : f32
    %28 = vector.broadcast %cst_13 : f32 to vector<8x128xf32>
    %29 = arith.mulf %28, %27 : vector<8x128xf32>
    %cst_14 = arith.constant 8.000000e+01 : f32
    %30 = vector.broadcast %cst_14 : f32 to vector<8x128xf32>
    %31 = arith.subf %24, %30 : vector<8x128xf32>
    %cst_15 = arith.constant 0.000000e+00 : f32
    %32 = vector.broadcast %cst_15 : f32 to vector<8x128xf32>
    %33 = arith.maximumf %31, %32 : vector<8x128xf32>
    %cst_16 = arith.constant -1.000000e+02 : f32
    %34 = vector.broadcast %cst_16 : f32 to vector<8x128xf32>
    %35 = arith.mulf %34, %33 : vector<8x128xf32>
    %cst_17 = arith.constant 2.000000e+01 : f32
    %36 = vector.broadcast %cst_17 : f32 to vector<8x128xf32>
    %37 = arith.subf %36, %24 : vector<8x128xf32>
    %cst_18 = arith.constant 0.000000e+00 : f32
    %38 = vector.broadcast %cst_18 : f32 to vector<8x128xf32>
    %39 = arith.maximumf %37, %38 : vector<8x128xf32>
    %cst_19 = arith.constant -5.000000e+00 : f32
    %40 = vector.broadcast %cst_19 : f32 to vector<8x128xf32>
    %41 = arith.mulf %40, %39 : vector<8x128xf32>
    %42 = arith.addf %29, %35 : vector<8x128xf32>
    %43 = arith.addf %42, %41 : vector<8x128xf32>
    %44 = arith.addf %22, %43 : vector<8x128xf32>
    %c2 = arith.constant 2 : index
    %c0_20 = arith.constant 0 : index
    %c0_21 = arith.constant 0 : index
    %45 = vector.load %arg1[%c2, %c0_20, %c0_21] : memref<8x8x128xf32, #tpu.memory_space<vmem>>, vector<1x8x128xf32>
    %46 = vector.shape_cast %45 : vector<1x8x128xf32> to vector<8x128xf32>
    %cst_22 = arith.constant 1.000000e+02 : f32
    %47 = vector.broadcast %cst_22 : f32 to vector<8x128xf32>
    %48 = arith.subf %46, %47 : vector<8x128xf32>
    %49 = math.absf %48 : vector<8x128xf32>
    %cst_23 = arith.constant -0.00999999977 : f32
    %50 = vector.broadcast %cst_23 : f32 to vector<8x128xf32>
    %51 = arith.mulf %50, %49 : vector<8x128xf32>
    %cst_24 = arith.constant 1.800000e+02 : f32
    %52 = vector.broadcast %cst_24 : f32 to vector<8x128xf32>
    %53 = arith.subf %46, %52 : vector<8x128xf32>
    %cst_25 = arith.constant 0.000000e+00 : f32
    %54 = vector.broadcast %cst_25 : f32 to vector<8x128xf32>
    %55 = arith.maximumf %53, %54 : vector<8x128xf32>
    %cst_26 = arith.constant -1.000000e+02 : f32
    %56 = vector.broadcast %cst_26 : f32 to vector<8x128xf32>
    %57 = arith.mulf %56, %55 : vector<8x128xf32>
    %cst_27 = arith.constant 2.000000e+01 : f32
    %58 = vector.broadcast %cst_27 : f32 to vector<8x128xf32>
    %59 = arith.subf %58, %46 : vector<8x128xf32>
    %cst_28 = arith.constant 0.000000e+00 : f32
    %60 = vector.broadcast %cst_28 : f32 to vector<8x128xf32>
    %61 = arith.maximumf %59, %60 : vector<8x128xf32>
    %cst_29 = arith.constant -5.000000e+00 : f32
    %62 = vector.broadcast %cst_29 : f32 to vector<8x128xf32>
    %63 = arith.mulf %62, %61 : vector<8x128xf32>
    %64 = arith.addf %51, %57 : vector<8x128xf32>
    %65 = arith.addf %64, %63 : vector<8x128xf32>
    %66 = arith.addf %44, %65 : vector<8x128xf32>
    %c3 = arith.constant 3 : index
    %c0_30 = arith.constant 0 : index
    %c0_31 = arith.constant 0 : index
    %67 = vector.load %arg1[%c3, %c0_30, %c0_31] : memref<8x8x128xf32, #tpu.memory_space<vmem>>, vector<1x8x128xf32>
    %68 = vector.shape_cast %67 : vector<1x8x128xf32> to vector<8x128xf32>
    %cst_32 = arith.constant 1.500000e+02 : f32
    %69 = vector.broadcast %cst_32 : f32 to vector<8x128xf32>
    %70 = arith.subf %68, %69 : vector<8x128xf32>
    %71 = math.absf %70 : vector<8x128xf32>
    %cst_33 = arith.constant -0.00999999977 : f32
    %72 = vector.broadcast %cst_33 : f32 to vector<8x128xf32>
    %73 = arith.mulf %72, %71 : vector<8x128xf32>
    %cst_34 = arith.constant 2.800000e+02 : f32
    %74 = vector.broadcast %cst_34 : f32 to vector<8x128xf32>
    %75 = arith.subf %68, %74 : vector<8x128xf32>
    %cst_35 = arith.constant 0.000000e+00 : f32
    %76 = vector.broadcast %cst_35 : f32 to vector<8x128xf32>
    %77 = arith.maximumf %75, %76 : vector<8x128xf32>
    %cst_36 = arith.constant -1.000000e+02 : f32
    %78 = vector.broadcast %cst_36 : f32 to vector<8x128xf32>
    %79 = arith.mulf %78, %77 : vector<8x128xf32>
    %cst_37 = arith.constant 2.000000e+01 : f32
    %80 = vector.broadcast %cst_37 : f32 to vector<8x128xf32>
    %81 = arith.subf %80, %68 : vector<8x128xf32>
    %cst_38 = arith.constant 0.000000e+00 : f32
    %82 = vector.broadcast %cst_38 : f32 to vector<8x128xf32>
    %83 = arith.maximumf %81, %82 : vector<8x128xf32>
    %cst_39 = arith.constant -5.000000e+00 : f32
    %84 = vector.broadcast %cst_39 : f32 to vector<8x128xf32>
    %85 = arith.mulf %84, %83 : vector<8x128xf32>
    %86 = arith.addf %73, %79 : vector<8x128xf32>
    %87 = arith.addf %86, %85 : vector<8x128xf32>
    %88 = arith.addf %66, %87 : vector<8x128xf32>
    %c4 = arith.constant 4 : index
    %c0_40 = arith.constant 0 : index
    %c0_41 = arith.constant 0 : index
    %89 = vector.load %arg1[%c4, %c0_40, %c0_41] : memref<8x8x128xf32, #tpu.memory_space<vmem>>, vector<1x8x128xf32>
    %90 = vector.shape_cast %89 : vector<1x8x128xf32> to vector<8x128xf32>
    %cst_42 = arith.constant 2.000000e+02 : f32
    %91 = vector.broadcast %cst_42 : f32 to vector<8x128xf32>
    %92 = arith.subf %90, %91 : vector<8x128xf32>
    %93 = math.absf %92 : vector<8x128xf32>
    %cst_43 = arith.constant -0.00999999977 : f32
    %94 = vector.broadcast %cst_43 : f32 to vector<8x128xf32>
    %95 = arith.mulf %94, %93 : vector<8x128xf32>
    %cst_44 = arith.constant 3.800000e+02 : f32
    %96 = vector.broadcast %cst_44 : f32 to vector<8x128xf32>
    %97 = arith.subf %90, %96 : vector<8x128xf32>
    %cst_45 = arith.constant 0.000000e+00 : f32
    %98 = vector.broadcast %cst_45 : f32 to vector<8x128xf32>
    %99 = arith.maximumf %97, %98 : vector<8x128xf32>
    %cst_46 = arith.constant -1.000000e+02 : f32
    %100 = vector.broadcast %cst_46 : f32 to vector<8x128xf32>
    %101 = arith.mulf %100, %99 : vector<8x128xf32>
    %cst_47 = arith.constant 2.000000e+01 : f32
    %102 = vector.broadcast %cst_47 : f32 to vector<8x128xf32>
    %103 = arith.subf %102, %90 : vector<8x128xf32>
    %cst_48 = arith.constant 0.000000e+00 : f32
    %104 = vector.broadcast %cst_48 : f32 to vector<8x128xf32>
    %105 = arith.maximumf %103, %104 : vector<8x128xf32>
    %cst_49 = arith.constant -5.000000e+00 : f32
    %106 = vector.broadcast %cst_49 : f32 to vector<8x128xf32>
    %107 = arith.mulf %106, %105 : vector<8x128xf32>
    %108 = arith.addf %95, %101 : vector<8x128xf32>
    %109 = arith.addf %108, %107 : vector<8x128xf32>
    %110 = arith.addf %88, %109 : vector<8x128xf32>
    %c5 = arith.constant 5 : index
    %c0_50 = arith.constant 0 : index
    %c0_51 = arith.constant 0 : index
    %111 = vector.load %arg1[%c5, %c0_50, %c0_51] : memref<8x8x128xf32, #tpu.memory_space<vmem>>, vector<1x8x128xf32>
    %112 = vector.shape_cast %111 : vector<1x8x128xf32> to vector<8x128xf32>
    %cst_52 = arith.constant 2.500000e+02 : f32
    %113 = vector.broadcast %cst_52 : f32 to vector<8x128xf32>
    %114 = arith.subf %112, %113 : vector<8x128xf32>
    %115 = math.absf %114 : vector<8x128xf32>
    %cst_53 = arith.constant -0.00999999977 : f32
    %116 = vector.broadcast %cst_53 : f32 to vector<8x128xf32>
    %117 = arith.mulf %116, %115 : vector<8x128xf32>
    %cst_54 = arith.constant 4.800000e+02 : f32
    %118 = vector.broadcast %cst_54 : f32 to vector<8x128xf32>
    %119 = arith.subf %112, %118 : vector<8x128xf32>
    %cst_55 = arith.constant 0.000000e+00 : f32
    %120 = vector.broadcast %cst_55 : f32 to vector<8x128xf32>
    %121 = arith.maximumf %119, %120 : vector<8x128xf32>
    %cst_56 = arith.constant -1.000000e+02 : f32
    %122 = vector.broadcast %cst_56 : f32 to vector<8x128xf32>
    %123 = arith.mulf %122, %121 : vector<8x128xf32>
    %cst_57 = arith.constant 2.000000e+01 : f32
    %124 = vector.broadcast %cst_57 : f32 to vector<8x128xf32>
    %125 = arith.subf %124, %112 : vector<8x128xf32>
    %cst_58 = arith.constant 0.000000e+00 : f32
    %126 = vector.broadcast %cst_58 : f32 to vector<8x128xf32>
    %127 = arith.maximumf %125, %126 : vector<8x128xf32>
    %cst_59 = arith.constant -5.000000e+00 : f32
    %128 = vector.broadcast %cst_59 : f32 to vector<8x128xf32>
    %129 = arith.mulf %128, %127 : vector<8x128xf32>
    %130 = arith.addf %117, %123 : vector<8x128xf32>
    %131 = arith.addf %130, %129 : vector<8x128xf32>
    %132 = arith.addf %110, %131 : vector<8x128xf32>
    %c6 = arith.constant 6 : index
    %c0_60 = arith.constant 0 : index
    %c0_61 = arith.constant 0 : index
    %133 = vector.load %arg1[%c6, %c0_60, %c0_61] : memref<8x8x128xf32, #tpu.memory_space<vmem>>, vector<1x8x128xf32>
    %134 = vector.shape_cast %133 : vector<1x8x128xf32> to vector<8x128xf32>
    %cst_62 = arith.constant 4.000000e+02 : f32
    %135 = vector.broadcast %cst_62 : f32 to vector<8x128xf32>
    %136 = arith.subf %134, %135 : vector<8x128xf32>
    %137 = math.absf %136 : vector<8x128xf32>
    %cst_63 = arith.constant -0.00999999977 : f32
    %138 = vector.broadcast %cst_63 : f32 to vector<8x128xf32>
    %139 = arith.mulf %138, %137 : vector<8x128xf32>
    %cst_64 = arith.constant 7.800000e+02 : f32
    %140 = vector.broadcast %cst_64 : f32 to vector<8x128xf32>
    %141 = arith.subf %134, %140 : vector<8x128xf32>
    %cst_65 = arith.constant 0.000000e+00 : f32
    %142 = vector.broadcast %cst_65 : f32 to vector<8x128xf32>
    %143 = arith.maximumf %141, %142 : vector<8x128xf32>
    %cst_66 = arith.constant -1.000000e+02 : f32
    %144 = vector.broadcast %cst_66 : f32 to vector<8x128xf32>
    %145 = arith.mulf %144, %143 : vector<8x128xf32>
    %cst_67 = arith.constant 2.000000e+01 : f32
    %146 = vector.broadcast %cst_67 : f32 to vector<8x128xf32>
    %147 = arith.subf %146, %134 : vector<8x128xf32>
    %cst_68 = arith.constant 0.000000e+00 : f32
    %148 = vector.broadcast %cst_68 : f32 to vector<8x128xf32>
    %149 = arith.maximumf %147, %148 : vector<8x128xf32>
    %cst_69 = arith.constant -5.000000e+00 : f32
    %150 = vector.broadcast %cst_69 : f32 to vector<8x128xf32>
    %151 = arith.mulf %150, %149 : vector<8x128xf32>
    %152 = arith.addf %139, %145 : vector<8x128xf32>
    %153 = arith.addf %152, %151 : vector<8x128xf32>
    %154 = arith.addf %132, %153 : vector<8x128xf32>
    %c7 = arith.constant 7 : index
    %c0_70 = arith.constant 0 : index
    %c0_71 = arith.constant 0 : index
    %155 = vector.load %arg1[%c7, %c0_70, %c0_71] : memref<8x8x128xf32, #tpu.memory_space<vmem>>, vector<1x8x128xf32>
    %156 = vector.shape_cast %155 : vector<1x8x128xf32> to vector<8x128xf32>
    %cst_72 = arith.constant 5.000000e+02 : f32
    %157 = vector.broadcast %cst_72 : f32 to vector<8x128xf32>
    %158 = arith.subf %156, %157 : vector<8x128xf32>
    %159 = math.absf %158 : vector<8x128xf32>
    %cst_73 = arith.constant -0.00999999977 : f32
    %160 = vector.broadcast %cst_73 : f32 to vector<8x128xf32>
    %161 = arith.mulf %160, %159 : vector<8x128xf32>
    %cst_74 = arith.constant 9.800000e+02 : f32
    %162 = vector.broadcast %cst_74 : f32 to vector<8x128xf32>
    %163 = arith.subf %156, %162 : vector<8x128xf32>
    %cst_75 = arith.constant 0.000000e+00 : f32
    %164 = vector.broadcast %cst_75 : f32 to vector<8x128xf32>
    %165 = arith.maximumf %163, %164 : vector<8x128xf32>
    %cst_76 = arith.constant -1.000000e+02 : f32
    %166 = vector.broadcast %cst_76 : f32 to vector<8x128xf32>
    %167 = arith.mulf %166, %165 : vector<8x128xf32>
    %cst_77 = arith.constant 2.000000e+01 : f32
    %168 = vector.broadcast %cst_77 : f32 to vector<8x128xf32>
    %169 = arith.subf %168, %156 : vector<8x128xf32>
    %cst_78 = arith.constant 0.000000e+00 : f32
    %170 = vector.broadcast %cst_78 : f32 to vector<8x128xf32>
    %171 = arith.maximumf %169, %170 : vector<8x128xf32>
    %cst_79 = arith.constant -5.000000e+00 : f32
    %172 = vector.broadcast %cst_79 : f32 to vector<8x128xf32>
    %173 = arith.mulf %172, %171 : vector<8x128xf32>
    %174 = arith.addf %161, %167 : vector<8x128xf32>
    %175 = arith.addf %174, %173 : vector<8x128xf32>
    %176 = arith.addf %154, %175 : vector<8x128xf32>
    %c0_80 = arith.constant 0 : index
    %c0_81 = arith.constant 0 : index
    %177 = vector.load %arg2[%c0_80, %c0_81] : memref<8x128xf32, #tpu.memory_space<vmem>>, vector<8x128xf32>
    tpu.vector_store %arg2[%c0_80, %c0_81], %176 {strides = array<i32>} : memref<8x128xf32, #tpu.memory_space<vmem>>, vector<8x128xf32>,
    return
  }
  func.func @transform_0(%arg0: i32) -> (i32, i32, i32) {
    %c0_i32 = arith.constant 0 : i32
    %c0_i32_0 = arith.constant 0 : i32
    %c0_i32_1 = arith.constant 0 : i32
    return %c0_i32, %arg0, %c0_i32_0 : i32, i32, i32
  }
  func.func @transform_1(%arg0: i32) -> (i32, i32) {
    %c0_i32 = arith.constant 0 : i32
    %c0_i32_0 = arith.constant 0 : i32
    return %arg0, %c0_i32 : i32, i32
  }
}

</mosaic_0001>

<bundles_post_ra>
// kernel: reservoir_reward.1
= control target key start
LH: loop header
LB: loop body
LE: loop exit
PB: predicated region body
PF: predicated region fallthrough
CT: control target
= control target key end

     0   :  { %s184_s0 = inlined_call_operand.vmem [shape: f32[8,8,128], index: 0, kind: input, shape index: {}]   ;;  %s185_s1 = inlined_call_operand.vmem [shape: f32[8,128], index: 1, kind: output, shape index: {}]  }
   0x1   :  { %v8_v0 = vld [vmem:[%s184_s0] sm:$0xff]  ;;  %v126_v1 = vld [vmem:[%s184_s0 + $0x8] sm:$0xff]  ;;  %v129_v2 = vld [vmem:[%s184_s0 + $0x10] sm:$0xff] }
   0x2   :  { %v124_v3 = vadd.f32 -50.0, %v8_v0  ;;  %v125_v4 = vadd.f32 -80.0, %v8_v0  ;;  %v15_v5 = vsub.f32 20.0, %v8_v0  ;;  %v127_v6 = vadd.f32 -50.0, %v126_v1  ;;  %v132_v11 = vld [vmem:[%s184_s0 + $0x18] sm:$0xff]  ;;  %v135_v20 = vld [vmem:[%s184_s0 + $0x20] sm:$0xff] }
   0x3   :  { %v128_v7 = vadd.f32 -80.0, %v126_v1  ;;  %v29_v8 = vsub.f32 20.0, %v126_v1  ;;  %v130_v9 = vadd.f32 -100.0, %v129_v2  ;;  %v131_v10 = vadd.f32 -180.0, %v129_v2  ;;  %v138_v45 = vld [vmem:[%s184_s0 + $0x28] sm:$0xff]  ;;  %v141_v50 = vld [vmem:[%s184_s0 + $0x30] sm:$0xff] }
   0x4   :  { %v10_v12 = vand.u32 2147483647, %v124_v3  ;;  %v13_v13 = vmax.f32 %v125_v4, 0.0  ;;  %v16_v14 = vmax.f32 %v15_v5, 0.0  ;;  %v24_v15 = vand.u32 2147483647, %v127_v6 }
   0x5   :  { %v27_v16 = vmax.f32 %v128_v7, 0.0  ;;  %v30_v17 = vmax.f32 %v29_v8, 0.0  ;;  %v38_v18 = vand.u32 2147483647, %v130_v9  ;;  %v41_v19 = vmax.f32 %v131_v10, 0.0  ;;  %v144_v7 = vld [vmem:[%s184_s0 + $0x38] sm:$0xff] }
   0x6   :  { %v11_v21 = vmul.f32 -0.01, %v10_v12  ;;  %v14_v22 = vmul.f32 -100.0, %v13_v13  ;;  %v17_v23 = vmul.f32 -5.0, %v16_v14  ;;  %v25_v24 = vmul.f32 -0.01, %v24_v15 }
   0x7   :  { %v28_v25 = vmul.f32 -100.0, %v27_v16  ;;  %v31_v26 = vmul.f32 -5.0, %v30_v17  ;;  %v39_v27 = vmul.f32 -0.01, %v38_v18  ;;  %v42_v28 = vmul.f32 -100.0, %v41_v19 }
   0x8   :  { %v18_v29 = vadd.f32 %v14_v22, %v11_v21  ;;  %v43_v30 = vsub.f32 20.0, %v129_v2  ;;  %v133_v31 = vadd.f32 -150.0, %v132_v11  ;;  %v134_v32 = vadd.f32 -280.0, %v132_v11 }
   0x9   :  { %v32_v33 = vadd.f32 %v28_v25, %v25_v24  ;;  %v46_v34 = vadd.f32 %v42_v28, %v39_v27  ;;  %v57_v35 = vsub.f32 20.0, %v132_v11  ;;  %v136_v36 = vadd.f32 -200.0, %v135_v20 }
   0xa   :  { %v19_v37 = vadd.f32 %v18_v29, %v17_v23  ;;  %v44_v38 = vmax.f32 %v43_v30, 0.0  ;;  %v52_v39 = vand.u32 2147483647, %v133_v31  ;;  %v55_v40 = vmax.f32 %v134_v32, 0.0 }
   0xb   :  { %v33_v41 = vadd.f32 %v32_v33, %v31_v26  ;;  %v58_v42 = vmax.f32 %v57_v35, 0.0  ;;  %v66_v43 = vand.u32 2147483647, %v136_v36  ;;  %v137_v44 = vadd.f32 -380.0, %v135_v20 }
   0xc   :  { %v45_v46 = vmul.f32 -5.0, %v44_v38  ;;  %v53_v47 = vmul.f32 -0.01, %v52_v39  ;;  %v56_v48 = vmul.f32 -100.0, %v55_v40  ;;  %v71_v49 = vsub.f32 20.0, %v135_v20 }
   0xd   :  { %v34_v51 = vadd.f32 %v33_v41, %v19_v37  ;;  %v59_v52 = vmul.f32 -5.0, %v58_v42  ;;  %v67_v53 = vmul.f32 -0.01, %v66_v43  ;;  %v69_v54 = vmax.f32 %v137_v44, 0.0 }
   0xe   :  { %v47_v55 = vadd.f32 %v46_v34, %v45_v46  ;;  %v60_v56 = vadd.f32 %v56_v48, %v53_v47  ;;  %v72_v57 = vmax.f32 %v71_v49, 0.0  ;;  %v139_v58 = vadd.f32 -250.0, %v138_v45 }
   0xf   :  { %v70_v59 = vmul.f32 -100.0, %v69_v54  ;;  %v140_v60 = vadd.f32 -480.0, %v138_v45  ;;  %v85_v61 = vsub.f32 20.0, %v138_v45  ;;  %v142_v62 = vadd.f32 -400.0, %v141_v50 }
  0x10   :  { %v48_v63 = vadd.f32 %v47_v55, %v34_v51  ;;  %v61_v0 = vadd.f32 %v60_v56, %v59_v52  ;;  %v73_v1 = vmul.f32 -5.0, %v72_v57  ;;  %v80_v2 = vand.u32 2147483647, %v139_v58 }
  0x11   :  { %v74_v3 = vadd.f32 %v70_v59, %v67_v53  ;;  %v83_v4 = vmax.f32 %v140_v60, 0.0  ;;  %v86_v5 = vmax.f32 %v85_v61, 0.0  ;;  %v94_v6 = vand.u32 2147483647, %v142_v62 }
  0x12   :  { %v62_v8 = vadd.f32 %v61_v0, %v48_v63  ;;  %v81_v9 = vmul.f32 -0.01, %v80_v2  ;;  %v143_v10 = vadd.f32 -780.0, %v141_v50  ;;  %v99_v11 = vsub.f32 20.0, %v141_v50 }
  0x13   :  { %v75_v12 = vadd.f32 %v74_v3, %v73_v1  ;;  %v84_v13 = vmul.f32 -100.0, %v83_v4  ;;  %v87_v14 = vmul.f32 -5.0, %v86_v5  ;;  %v95_v15 = vmul.f32 -0.01, %v94_v6 }
  0x14   :  { %v97_v16 = vmax.f32 %v143_v10, 0.0  ;;  %v100_v17 = vmax.f32 %v99_v11, 0.0  ;;  %v145_v18 = vadd.f32 -500.0, %v144_v7  ;;  %v146_v19 = vadd.f32 -980.0, %v144_v7 }
  0x15   :  { %v76_v20 = vadd.f32 %v75_v12, %v62_v8  ;;  %v88_v21 = vadd.f32 %v84_v13, %v81_v9  ;;  %v113_v22 = vsub.f32 20.0, %v144_v7 }
  0x16   :  { %v98_v23 = vmul.f32 -100.0, %v97_v16  ;;  %v101_v24 = vmul.f32 -5.0, %v100_v17  ;;  %v108_v25 = vand.u32 2147483647, %v145_v18  ;;  %v111_v26 = vmax.f32 %v146_v19, 0.0 }
  0x17   :  { %v89_v27 = vadd.f32 %v88_v21, %v87_v14  ;;  %v114_v28 = vmax.f32 %v113_v22, 0.0 }
  0x18   :  { %v102_v29 = vadd.f32 %v98_v23, %v95_v15  ;;  %v109_v30 = vmul.f32 -0.01, %v108_v25  ;;  %v112_v31 = vmul.f32 -100.0, %v111_v26 }
  0x19   :  { %v90_v32 = vadd.f32 %v89_v27, %v76_v20  ;;  %v115_v33 = vmul.f32 -5.0, %v114_v28 }
  0x1a   :  { %v103_v34 = vadd.f32 %v102_v29, %v101_v24  ;;  %v116_v35 = vadd.f32 %v112_v31, %v109_v30 }
  0x1c   :  { %v104_v36 = vadd.f32 %v103_v34, %v90_v32  ;;  %v117_v37 = vadd.f32 %v116_v35, %v115_v33 }
  0x1e   :  { %v118_v38 = vadd.f32 %v117_v37, %v104_v36 }
  0x20   :  { %119 = vst [vmem:[%s185_s1] sm:$0xff] %v118_v38 }

</bundles_post_ra>
